<compile_context>
chip_gen: v6e
topology: v6e:2x2x1
jax: 0.10.0
libtpu: 0.0.40
codegen_flags: <defaults>
</compile_context>

<pallas_src>
import functools

import jax
import jax.numpy as jnp
from jax.experimental import pallas as pl
from jax.experimental.pallas import tpu as pltpu


# Batches (after rounding up to the 128-lane width) at or below this size run
# as one un-gridded block -- the whole working set is a few KB.
_SINGLE_BLOCK_MAX_B = 1024
# Conservative per-block activation budget; keeps tiles comfortably inside the
# default scoped-VMEM limit even on v7x (64 MiB physical / 32 MiB scoped).
_VMEM_ACT_BUDGET_BYTES = 8 * 1024 * 1024


def _round_up(x, m):
    return ((x + m - 1) // m) * m


def _fcn_kernel(xT_ref, w_in_ref, b_in_ref, wh_ref, bh_ref, w_out_ref,
                b_out_ref, o_ref):
    """Whole MLP forward, feature-major, entirely in VMEM.

    xT_ref:    (N_INPUT, TB)         batch on the lane axis
    w_in_ref:  (H, N_INPUT),   b_in_ref:  (H, 1)
    wh_ref:    (NH, H, H),     bh_ref:    (NH, H, 1)   (NH = N_LAYERS - 1)
    w_out_ref: (N_OUTPUT, H),  b_out_ref: (N_OUTPUT, 1)
    o_ref:     (N_OUTPUT, TB)
    """
    x = xT_ref[...]
    if xT_ref.shape[0] == 1:
        # N_INPUT == 1 (the PINN case): a K=1 matmul is a degenerate MXU op
        # (full fill/drain latency for one contraction step).  A VPU broadcast
        # multiply (H,1)*(1,TB) does the same work in an otherwise-idle slot.
        pre = w_in_ref[...] * x + b_in_ref[...]
    else:
        pre = jnp.dot(w_in_ref[...], x,
                      preferred_element_type=jnp.float32) + b_in_ref[...]
    h = jnp.tanh(pre)

    # Hidden layers (static unroll -- NH is tiny here).
    # TODO(synk): switch to lax.fori_loop(..., unroll=True) if N_LAYERS grows;
    # consider bf16 matmul inputs (keep f32 bias/tanh on v5e) once H >= 256.
    for l in range(wh_ref.shape[0]):
        h = jnp.tanh(
            jnp.dot(wh_ref[l], h, preferred_element_type=jnp.float32)
            + bh_ref[l])

    # Output layer (no activation); lane-dense unmasked store.
    out = jnp.dot(w_out_ref[...], h, preferred_element_type=jnp.float32) \
        + b_out_ref[...]
    o_ref[...] = out.astype(o_ref.dtype)


def init_fcn_params(key, n_input, n_output, n_hidden, n_layers):
    """Torch-layout params mimicking nn.Linear init (U(+-1/sqrt(fan_in)))."""
    def linear(key, fan_in, fan_out):
        kw, kb = jax.random.split(key)
        bound = 1.0 / jnp.sqrt(jnp.float32(fan_in))
        w = jax.random.uniform(kw, (fan_in, fan_out), jnp.float32, -bound, bound)
        b = jax.random.uniform(kb, (1, fan_out), jnp.float32, -bound, bound)
        return w, b

    keys = jax.random.split(key, n_layers + 1)
    w_in, b_in = linear(keys[0], n_input, n_hidden)
    wh_list, bh_list = [], []
    for l in range(n_layers - 1):
        w, b = linear(keys[1 + l], n_hidden, n_hidden)
        wh_list.append(w)
        bh_list.append(b)
    wh = jnp.stack(wh_list, axis=0)                      # (NH, H, H)
    bh = jnp.stack(bh_list, axis=0)                      # (NH, 1, H)
    w_out, b_out = linear(keys[n_layers], n_hidden, n_output)
    return w_in, b_in, wh, bh, w_out, b_out


def prepare_fcn_params(w_in, b_in, wh, bh, w_out, b_out):
    """One-time torch-layout -> feature-major conversion (NOT per forward call).

    Keeps the 6 transposes out of the jitted forward path, where at PINN sizes
    they cost roughly as much HBM traffic as the kernel itself.
    """
    return (jnp.asarray(w_in.T, jnp.float32),                        # (H, N_IN)
            jnp.asarray(b_in.T, jnp.float32),                        # (H, 1)
            jnp.asarray(jnp.transpose(wh, (0, 2, 1)), jnp.float32),  # (NH,H,H)
            jnp.asarray(jnp.transpose(bh, (0, 2, 1)), jnp.float32),  # (NH,H,1)
            jnp.asarray(w_out.T, jnp.float32),                       # (N_OUT,H)
            jnp.asarray(b_out.T, jnp.float32))                       # (N_OUT,1)


@functools.partial(jax.jit, static_argnames=("tile_b",))
def fcn_forward(x, w_in_T, b_in_T, wh_T, bh_T, w_out_T, b_out_T, *,
                tile_b=None):
    """x: (B, N_INPUT) -> (B, N_OUTPUT).  Params must come from
    prepare_fcn_params (feature-major)."""
    B, n_in = x.shape
    n_hidden = w_in_T.shape[0]
    n_out = w_out_T.shape[0]
    nh = wh_T.shape[0]

    # ---- batch-tile selection --------------------------------------------
    B128 = _round_up(B, 128)                     # lane-dense minimum padding
    # Shape-aware tile cap: x column + out column + ~2 live activation bufs.
    bytes_per_col = 4 * (n_in + n_out + 2 * n_hidden)
    tb_cap = max(128, (_VMEM_ACT_BUDGET_BYTES // bytes_per_col) // 128 * 128)
    if tile_b is None:
        if B128 <= _SINGLE_BLOCK_MAX_B:
            tb = B128                            # single block, no grid
        else:
            # >= 2 "parallel" steps so v7x's second TensorCore has work, and
            # a bounded tile so DMAs pipeline and VMEM stays in budget.
            tb = min(tb_cap, _round_up((B128 + 1) // 2, 128))
    else:
        tb = _round_up(min(tile_b, B128), 128)
    B_pad = _round_up(B, tb)                     # pad so tb divides the batch

    # Single cheap pad op; feature-major with batch on the lane axis.
    xT = jnp.pad(x.astype(jnp.float32).T, ((0, 0), (0, B_pad - B)))

    out_shape = jax.ShapeDtypeStruct((n_out, B_pad), jnp.float32)
    args = (xT, w_in_T, b_in_T, wh_T, bh_T, w_out_T, b_out_T)

    if B_pad == tb:
        # Tiny / default PINN case: skip the grid machinery entirely and map
        # every operand whole into VMEM.
        vmem = pl.BlockSpec(memory_space=pltpu.MemorySpace.VMEM)
        outT = pl.pallas_call(
            _fcn_kernel,
            out_shape=out_shape,
            in_specs=[vmem] * len(args),
            out_specs=vmem,
        )(*args)
    else:
        # Large batch: 1-D "parallel" grid over batch tiles (weights are
        # grid-invariant and stay resident).
        # TODO(synk): mark the grid-invariant weight/bias specs with
        # pipeline_mode=pl.Buffered(1) once H/NH are large enough for the
        # double-buffered weight stack to pressure scoped VMEM.
        in_specs = [
            pl.BlockSpec((n_in, tb), lambda i: (0, i)),                   # xT
            pl.BlockSpec((n_hidden, n_in), lambda i: (0, 0)),             # w_in^T
            pl.BlockSpec((n_hidden, 1), lambda i: (0, 0)),                # b_in^T
            pl.BlockSpec((nh, n_hidden, n_hidden), lambda i: (0, 0, 0)),  # wh^T
            pl.BlockSpec((nh, n_hidden, 1), lambda i: (0, 0, 0)),         # bh^T
            pl.BlockSpec((n_out, n_hidden), lambda i: (0, 0)),            # w_out^T
            pl.BlockSpec((n_out, 1), lambda i: (0, 0)),                   # b_out^T
        ]
        outT = pl.pallas_call(
            _fcn_kernel,
            out_shape=out_shape,
            grid=(B_pad // tb,),
            in_specs=in_specs,
            out_specs=pl.BlockSpec((n_out, tb), lambda i: (0, i)),
            compiler_params=pltpu.CompilerParams(
                dimension_semantics=("parallel",)),
        )(*args)

    # Slice the lane padding off first, then transpose back to (B, N_OUTPUT).
    return outT[:, :B].T


def fcn_reference(x, w_in, b_in, wh, bh, w_out, b_out):
    """Pure-JAX reference in torch layout (mirrors the PyTorch forward)."""
    h = jnp.tanh(x @ w_in + b_in)
    for l in range(wh.shape[0]):
        h = jnp.tanh(h @ wh[l] + bh[l])
    return h @ w_out + b_out


if __name__ == "__main__":
    # Shapes consistent with the PINN usage: x = linspace(0, 1, 500) samples.
    N_INPUT, N_OUTPUT, N_HIDDEN, N_LAYERS = 1, 1, 32, 3
    BATCH = 500

    key = jax.random.PRNGKey(0)
    kx, kp = jax.random.split(key)

    params = init_fcn_params(kp, N_INPUT, N_OUTPUT, N_HIDDEN, N_LAYERS)
    fm_params = prepare_fcn_params(*params)      # one-time layout conversion

    # 1) Default PINN batch -> single un-gridded VMEM block.
    x1 = jnp.linspace(0.0, 1.0, BATCH, dtype=jnp.float32).reshape(-1, 1)
    out1 = jax.block_until_ready(fcn_forward(x1, *fm_params))
    ref1 = fcn_reference(x1, *params)
    assert out1.shape == (BATCH, N_OUTPUT), out1.shape
    assert jnp.allclose(out1, ref1, atol=2e-5, rtol=2e-5), (
        float(jnp.max(jnp.abs(out1 - ref1))))

    # 2) Larger batch with an explicit tile -> pipelined "parallel" grid path.
    BATCH2 = 1500
    x2 = jax.random.uniform(kx, (BATCH2, N_INPUT), jnp.float32)
    out2 = jax.block_until_ready(fcn_forward(x2, *fm_params, tile_b=512))
    ref2 = fcn_reference(x2, *params)
    assert out2.shape == (BATCH2, N_OUTPUT), out2.shape
    assert jnp.allclose(out2, ref2, atol=2e-5, rtol=2e-5), (
        float(jnp.max(jnp.abs(out2 - ref2))))

    print("KERNEL_OK")
</pallas_src>

<mosaic_0001>
module attributes {stable_mosaic.version = 11 : i64} {
  func.func @_fcn_kernel(%arg0: memref<1x512xf32, #tpu.memory_space<vmem>>, %arg1: memref<32x1xf32, #tpu.memory_space<vmem>>, %arg2: memref<32x1xf32, #tpu.memory_space<vmem>>, %arg3: memref<2x32x32xf32, #tpu.memory_space<vmem>>, %arg4: memref<2x32x1xf32, #tpu.memory_space<vmem>>, %arg5: memref<1x32xf32, #tpu.memory_space<vmem>>, %arg6: memref<1x1xf32, #tpu.memory_space<vmem>>, %arg7: memref<1x512xf32, #tpu.memory_space<vmem>>) attributes {dimension_semantics = [], scalar_prefetch = 0 : i64, scratch_operands = 0 : i64, tpu.core_type = #tpu.core_type<tc>} {
    %c0 = arith.constant 0 : index
    %c0_0 = arith.constant 0 : index
    %0 = vector.load %arg0[%c0, %c0_0] : memref<1x512xf32, #tpu.memory_space<vmem>>, vector<1x512xf32>
    %c0_1 = arith.constant 0 : index
    %c0_2 = arith.constant 0 : index
    %1 = vector.load %arg1[%c0_1, %c0_2] : memref<32x1xf32, #tpu.memory_space<vmem>>, vector<32x1xf32>
    %2 = vector.broadcast %1 : vector<32x1xf32> to vector<32x512xf32>
    %3 = vector.broadcast %0 : vector<1x512xf32> to vector<32x512xf32>
    %4 = arith.mulf %2, %3 : vector<32x512xf32>
    %c0_3 = arith.constant 0 : index
    %c0_4 = arith.constant 0 : index
    %5 = vector.load %arg2[%c0_3, %c0_4] : memref<32x1xf32, #tpu.memory_space<vmem>>, vector<32x1xf32>
    %6 = vector.broadcast %5 : vector<32x1xf32> to vector<32x512xf32>
    %7 = arith.addf %4, %6 : vector<32x512xf32>
    %8 = math.tanh %7 : vector<32x512xf32>
    %c0_5 = arith.constant 0 : index
    %c0_6 = arith.constant 0 : index
    %c0_7 = arith.constant 0 : index
    %9 = vector.load %arg3[%c0_5, %c0_6, %c0_7] : memref<2x32x32xf32, #tpu.memory_space<vmem>>, vector<1x32x32xf32>
    %10 = vector.shape_cast %9 : vector<1x32x32xf32> to vector<32x32xf32>
    %cst = arith.constant dense<0.000000e+00> : vector<32x512xf32>
    %11 = tpu.matmul %10, %8, %cst {dimension_numbers = #tpu.dot_dimension_numbers<[1], [0], [0], [1], [0, 0, 1, 1], [], []>} : vector<32x32xf32>, vector<32x512xf32>, vector<32x512xf32> -> vector<32x512xf32>
    %c0_8 = arith.constant 0 : index
    %c0_9 = arith.constant 0 : index
    %c0_10 = arith.constant 0 : index
    %12 = vector.load %arg4[%c0_8, %c0_9, %c0_10] : memref<2x32x1xf32, #tpu.memory_space<vmem>>, vector<1x32x1xf32>
    %13 = vector.shape_cast %12 : vector<1x32x1xf32> to vector<32x1xf32>
    %14 = vector.broadcast %13 : vector<32x1xf32> to vector<32x512xf32>
    %15 = arith.addf %11, %14 : vector<32x512xf32>
    %16 = math.tanh %15 : vector<32x512xf32>
    %c1 = arith.constant 1 : index
    %c0_11 = arith.constant 0 : index
    %c0_12 = arith.constant 0 : index
    %17 = vector.load %arg3[%c1, %c0_11, %c0_12] : memref<2x32x32xf32, #tpu.memory_space<vmem>>, vector<1x32x32xf32>
    %18 = vector.shape_cast %17 : vector<1x32x32xf32> to vector<32x32xf32>
    %cst_13 = arith.constant dense<0.000000e+00> : vector<32x512xf32>
    %19 = tpu.matmul %18, %16, %cst_13 {dimension_numbers = #tpu.dot_dimension_numbers<[1], [0], [0], [1], [0, 0, 1, 1], [], []>} : vector<32x32xf32>, vector<32x512xf32>, vector<32x512xf32> -> vector<32x512xf32>
    %c1_14 = arith.constant 1 : index
    %c0_15 = arith.constant 0 : index
    %c0_16 = arith.constant 0 : index
    %20 = vector.load %arg4[%c1_14, %c0_15, %c0_16] : memref<2x32x1xf32, #tpu.memory_space<vmem>>, vector<1x32x1xf32>
    %21 = vector.shape_cast %20 : vector<1x32x1xf32> to vector<32x1xf32>
    %22 = vector.broadcast %21 : vector<32x1xf32> to vector<32x512xf32>
    %23 = arith.addf %19, %22 : vector<32x512xf32>
    %24 = math.tanh %23 : vector<32x512xf32>
    %c0_17 = arith.constant 0 : index
    %c0_18 = arith.constant 0 : index
    %25 = vector.load %arg5[%c0_17, %c0_18] : memref<1x32xf32, #tpu.memory_space<vmem>>, vector<1x32xf32>
    %cst_19 = arith.constant dense<0.000000e+00> : vector<1x512xf32>
    %26 = tpu.matmul %25, %24, %cst_19 {dimension_numbers = #tpu.dot_dimension_numbers<[1], [0], [0], [1], [0, 0, 1, 1], [], []>} : vector<1x32xf32>, vector<32x512xf32>, vector<1x512xf32> -> vector<1x512xf32>
    %c0_20 = arith.constant 0 : index
    %c0_21 = arith.constant 0 : index
    %27 = vector.load %arg6[%c0_20, %c0_21] : memref<1x1xf32, #tpu.memory_space<vmem>>, vector<1x1xf32>
    %28 = vector.broadcast %27 : vector<1x1xf32> to vector<1x512xf32>
    %29 = arith.addf %26, %28 : vector<1x512xf32>
    %c0_22 = arith.constant 0 : index
    %c0_23 = arith.constant 0 : index
    %30 = vector.load %arg7[%c0_22, %c0_23] : memref<1x512xf32, #tpu.memory_space<vmem>>, vector<1x512xf32>
    tpu.vector_store %arg7[%c0_22, %c0_23], %29 {strides = array<i32>} : memref<1x512xf32, #tpu.memory_space<vmem>>, vector<1x512xf32>,
    return
  }
}

</mosaic_0001>

<bundles_post_ra>
// kernel: fcn_forward.1
= control target key start
LH: loop header
LB: loop body
LE: loop exit
PB: predicated region body
PF: predicated region fallthrough
CT: control target
= control target key end

     0   :  { %v938_v0 = vmov 0   ;;  %v939_v19 = vmov 0.0   ;;  %v54_v20 = vlaneseq  ;;  %vm174_vm0 = vcmask 261120   ;;  %s1114_s2 = inlined_call_operand.vmem [shape: f32[32,1], index: 2, kind: input, shape index: {}]   ;;  %s1115_s1 = inlined_call_operand.vmem [shape: f32[32,1], index: 1, kind: input, shape index: {}]   ;;  %s1116_s6 = inlined_call_operand.<no memory space> [shape: f32[1,1], index: 6, kind: input, shape index: {}]   ;;  %s1117_s4 = inlined_call_operand.vmem [shape: f32[2,32,1], index: 4, kind: input, shape index: {}]   ;;  %s1118_s0 = inlined_call_operand.vmem [shape: f32[1,512], index: 0, kind: input, shape index: {}]   ;;  %s1119_s3 = inlined_call_operand.vmem [shape: f32[2,32,32], index: 3, kind: input, shape index: {}]   ;;  %s1120_s5 = inlined_call_operand.vmem [shape: f32[1,32], index: 5, kind: input, shape index: {}]   ;;  %s1121_s7 = inlined_call_operand.vmem [shape: f32[1,512], index: 7, kind: output, shape index: {}]  }
   0x1   :  { %841 = vset.pattern.permute.xlu1 %v938_v0  ;;  %840 = vset.pattern.permute.xlu0 %v938_v0  ;;  %v93_v1 = vld [vmem:[%s1114_s2 + $0x18] sm:$0xff]  ;;  %v12_v3 = vstv %s1116_s6  ;;  %v31_v4 = vld [vmem:[%s1115_s1 + $0x10] sm:$0xff]  ;;  %v30_v5 = vld [vmem:[%s1115_s1 + $0x8] sm:$0xff] }
   0x2   :  { %v32_v2 = vld [vmem:[%s1115_s1 + $0x18] sm:$0xff]  ;;  %111 = vperm.xlu1 %841, %v93_v1   ;;  %13 = vst [vmem:[#allocation2] sm:$0x1] %v12_v3  ;;  %v92_v6 = vld [vmem:[%s1114_s2 + $0x10] sm:$0xff]  ;;  %v29_v7 = vld [vmem:[%s1115_s1] sm:$0xff]  ;;  %251 = vmatprep.mubr.f32.mxu0 %v939_v19  ;;  %v1035_v21 = vshrl.u32 %v54_v20, 7 }
   0x3   :  { %50 = vperm.xlu0 %840, %v32_v2   ;;  %v91_v8 = vld [vmem:[%s1114_s2 + $0x8] sm:$0xff]  ;;  %v90_v9 = vld [vmem:[%s1114_s2] sm:$0xff]  ;;  %v153_v10 = vld [vmem:[%s1117_s4 + $0x18] sm:$0xff]  ;;  %340 = vmatprep.mubr.f32.mxu1 %v939_v19  ;;  %vm804_vm1 = vcmp.lt.s32.totalorder %v54_v20, 512 }
   0x4   :  { %v152_v11 = vld [vmem:[%s1117_s4 + $0x10] sm:$0xff]  ;;  %v151_v12 = vld [vmem:[%s1117_s4 + $0x8] sm:$0xff]  ;;  %v150_v13 = vld [vmem:[%s1117_s4] sm:$0xff]  ;;  %v56_v22 = vsub.s32 0, %v1035_v21  ;;  %v64_v23 = vsub.s32 2, %v1035_v21  ;;  %v60_v24 = vsub.s32 1, %v1035_v21 }
   0x5   :  { %v826_v14 = vld [vmem:[%s1117_s4 + $0x38] sm:$0xff]  ;;  %v825_v15 = vld [vmem:[%s1117_s4 + $0x30] sm:$0xff]  ;;  %v824_v16 = vld [vmem:[%s1117_s4 + $0x28] sm:$0xff]  ;;  %v68_v25 = vsub.s32 3, %v1035_v21 }
   0x6   :  { %40 = vperm.xlu1 %841, %v30_v5   ;;  %v823_v17 = vld [vmem:[%s1117_s4 + $0x20] sm:$0xff] }
   0x7   :  { %45 = vperm.xlu0 %840, %v31_v4   ;;  %v28_v26 = vld [vmem:[%s1118_s0] sm:$0xf] }
   0x8   :  { %v57_v27 = vrot.slane %v28_v26, %v56_v22  ;;  %v65_v28 = vrot.slane %v28_v26, %v64_v23  ;;  %v61_v29 = vrot.slane %v28_v26, %v60_v24  ;;  %v69_v30 = vrot.slane %v28_v26, %v68_v25  ;;  %v146_v24 = vld [vmem:[%s1119_s3] sm:$0xff] }
   0x9   :  { %v618_v18 = vld [vmem:[#allocation2] sm:$0x1] }
   0xa   :  { %35 = vperm.xlu1 %841, %v29_v7  }
   0xb   :  { %106 = vperm.xlu0 %840, %v92_v6  }
   0xe   :  { %96 = vperm.xlu1 %841, %v90_v9  }
   0xf   :  { %101 = vperm.xlu0 %840, %v91_v8  }
  0x12   :  { %166 = vperm.xlu1 %841, %v152_v11  }
  0x13   :  { %171 = vperm.xlu0 %840, %v153_v10  }
  0x16   :  { %156 = vperm.xlu1 %841, %v150_v13  }
  0x17   :  { %161 = vperm.xlu0 %840, %v151_v12  }
  0x1a   :  { %403 = vperm.xlu1 %841, %v825_v15  }
  0x1b   :  { %408 = vperm.xlu0 %840, %v826_v14  }
  0x1e   :  { %393 = vperm.xlu1 %841, %v823_v17  }
  0x1f   :  { %398 = vperm.xlu0 %840, %v824_v16  }
  0x23   :  { %621 = vperm.xlu0 %840, %v618_v18  }
  0x7d   :  { %v112_v31 = vpop.permute.xlu1 %111 }
  0x7e   :  { %v51_v32 = vpop.permute.xlu0 %50 }
  0x7f   :  { %v86_v33 = vmul.f32 %v57_v27, %v51_v32  ;;  %v88_v34 = vmul.f32 %v65_v28, %v51_v32  ;;  %v87_v35 = vmul.f32 %v61_v29, %v51_v32  ;;  %v89_v36 = vmul.f32 %v69_v30, %v51_v32 }
  0x81   :  { %v126_v37 = vadd.f32 %v112_v31, %v86_v33  ;;  %v128_v38 = vadd.f32 %v112_v31, %v88_v34  ;;  %v127_v39 = vadd.f32 %v112_v31, %v87_v35  ;;  %v41_v41 = vpop.permute.xlu1 %40  ;;  %v129_v42 = vadd.f32 %v112_v31, %v89_v36 }
  0x82   :  { %v46_v40 = vpop.permute.xlu0 %45  ;;  %v78_v53 = vmul.f32 %v57_v27, %v41_v41  ;;  %v79_v54 = vmul.f32 %v61_v29, %v41_v41  ;;  %v80_v55 = vmul.f32 %v65_v28, %v41_v41  ;;  %v81_v56 = vmul.f32 %v69_v30, %v41_v41 }
  0x83   :  { %842 = vtanh.f32 %v126_v37  ;;  %v82_v43 = vmul.f32 %v57_v27, %v46_v40  ;;  %v83_v44 = vmul.f32 %v61_v29, %v46_v40  ;;  %v84_v45 = vmul.f32 %v65_v28, %v46_v40 }
  0x84   :  { %844 = vtanh.f32 %v128_v38  ;;  %v85_v46 = vmul.f32 %v69_v30, %v46_v40 }
  0x85   :  { %846 = vtanh.f32 %v127_v39  ;;  %v36_v48 = vpop.permute.xlu1 %35 }
  0x86   :  { %v107_v47 = vpop.permute.xlu0 %106  ;;  %848 = vtanh.f32 %v129_v42  ;;  %v75_v62 = vmul.f32 %v61_v29, %v36_v48  ;;  %v74_v0 = vmul.f32 %v57_v27, %v36_v48  ;;  %v77_v1 = vmul.f32 %v69_v30, %v36_v48  ;;  %v148_v29 = vld [vmem:[%s1119_s3 + $0x10] sm:$0xff]  ;;  %v149_v30 = vld [vmem:[%s1119_s3 + $0x18] sm:$0xff] }
  0x87   :  { %v122_v49 = vadd.f32 %v107_v47, %v82_v43  ;;  %v123_v50 = vadd.f32 %v107_v47, %v83_v44  ;;  %v124_v51 = vadd.f32 %v107_v47, %v84_v45  ;;  %v125_v52 = vadd.f32 %v107_v47, %v85_v46 }
  0x88   :  { %v76_v3 = vmul.f32 %v65_v28, %v36_v48  ;;  %v147_v28 = vld [vmem:[%s1119_s3 + $0x8] sm:$0xff] }
  0x89   :  { %850 = vtanh.f32 %v122_v49  ;;  %v97_v61 = vpop.permute.xlu1 %96 }
  0x8a   :  { %852 = vtanh.f32 %v123_v50  ;;  %v102_v57 = vpop.permute.xlu0 %101  ;;  %v115_v2 = vadd.f32 %v97_v61, %v75_v62  ;;  %v114_v4 = vadd.f32 %v97_v61, %v74_v0  ;;  %v117_v6 = vadd.f32 %v97_v61, %v77_v1 }
  0x8b   :  { %854 = vtanh.f32 %v124_v51  ;;  %v118_v58 = vadd.f32 %v102_v57, %v78_v53  ;;  %v119_v59 = vadd.f32 %v102_v57, %v79_v54  ;;  %v120_v60 = vadd.f32 %v102_v57, %v80_v55 }
  0x8c   :  { %856 = vtanh.f32 %v125_v52  ;;  %v121_v63 = vadd.f32 %v102_v57, %v81_v56  ;;  %v116_v8 = vadd.f32 %v97_v61, %v76_v3 }
  0x8d   :  { %858 = vtanh.f32 %v118_v58  ;;  %v167_v31 = vpop.permute.xlu1 %166 }
  0x8e   :  { %860 = vtanh.f32 %v119_v59  ;;  %v172_v33 = vpop.permute.xlu0 %171 }
  0x8f   :  { %862 = vtanh.f32 %v120_v60 }
  0x90   :  { %v843_v5 = vpop.eup %842  ;;  %864 = vtanh.f32 %v121_v63 }
  0x91   :  { %v845_v7 = vpop.eup %844  ;;  %866 = vtanh.f32 %v115_v2  ;;  %v157_v38 = vpop.permute.xlu1 %156 }
  0x92   :  { %v847_v9 = vpop.eup %846  ;;  %868 = vtanh.f32 %v114_v4  ;;  %v162_v41 = vpop.permute.xlu0 %161 }
  0x93   :  { %v849_v10 = vpop.eup %848  ;;  %211 = vmatprep.subr.mxu0 %v847_v9  ;;  %870 = vtanh.f32 %v117_v6 }
  0x94   :  { %300 = vmatprep.subr.mxu1 %v849_v10  ;;  %212 = vmatpush1.msra.mxu0 %v843_v5  ;;  %872 = vtanh.f32 %v116_v8 }
  0x95   :  { %301 = vmatpush1.msra.mxu1 %v845_v7 }
  0x96   :  { %v851_v11 = vpop.eup %850 }
  0x97   :  { %v853_v12 = vpop.eup %852 }
  0x98   :  { %v855_v13 = vpop.eup %854  ;;  %213 = vmatprep.subr.mxu0 %v853_v12 }
  0x99   :  { %v857_v14 = vpop.eup %856  ;;  %214 = vmatpush1.msra.mxu0 %v851_v11 }
  0x9a   :  { %v859_v15 = vpop.eup %858  ;;  %302 = vmatprep.subr.mxu1 %v857_v14 }
  0x9b   :  { %v861_v16 = vpop.eup %860  ;;  %303 = vmatpush1.msra.mxu1 %v855_v13 }
  0x9c   :  { %v863_v17 = vpop.eup %862  ;;  %215 = vmatprep.subr.mxu0 %v861_v16 }
  0x9d   :  { %v865_v18 = vpop.eup %864  ;;  %216 = vmatpush1.msra.mxu0 %v859_v15 }
  0x9e   :  { %304 = vmatprep.subr.mxu1 %v865_v18  ;;  %v867_v23 = vpop.eup %866 }
  0x9f   :  { %305 = vmatpush1.msra.mxu1 %v863_v17  ;;  %v869_v25 = vpop.eup %868  ;;  %217 = vmatprep.subr.mxu0 %v867_v23  ;;  %v819_v17 = vld [vmem:[%s1119_s3 + $0x20] sm:$0xff] }
  0xa0   :  { %v871_v26 = vpop.eup %870  ;;  %218 = vmatpush1.msra.mxu0 %v869_v25  ;;  %v821_v25 = vld [vmem:[%s1119_s3 + $0x30] sm:$0xff] }
  0xa1   :  { %v873_v27 = vpop.eup %872  ;;  %306 = vmatprep.subr.mxu1 %v871_v26  ;;  %811 = vmatmul.mubr.msk.f32.vlgmr.msra.gmra.mxu0 %vm174_vm0, %v146_v24  ;;  %v822_v26 = vld [vmem:[%s1119_s3 + $0x38] sm:$0xff] }
  0xa2   :  { %307 = vmatpush1.msra.mxu1 %v873_v27  ;;  %257 = vmatprep.mubr.f32.mxu0 %v939_v19  ;;  %v404_v27 = vpop.permute.xlu1 %403 }
  0xa3   :  { %815 = vmatmul.mubr.msk.f32.vlgmr.msra.gmra.mxu1 %vm174_vm0, %v146_v24  ;;  %v820_v24 = vld [vmem:[%s1119_s3 + $0x28] sm:$0xff] }
  0xa4   :  { %346 = vmatprep.mubr.f32.mxu1 %v939_v19 }
  0xa5   :  { %812 = vmatmul.mubr.msk.f32.gmra.mxu0 %vm174_vm0, %v147_v28 }
  0xa6   :  { %263 = vmatprep.mubr.f32.mxu0 %v939_v19 }
  0xa7   :  { %816 = vmatmul.mubr.msk.f32.gmra.mxu1 %vm174_vm0, %v147_v28 }
  0xa8   :  { %352 = vmatprep.mubr.f32.mxu1 %v939_v19 }
  0xa9   :  { %813 = vmatmul.mubr.msk.f32.gmra.mxu0 %vm174_vm0, %v148_v29 }
  0xaa   :  { %269 = vmatprep.mubr.f32.mxu0 %v939_v19 }
  0xab   :  { %817 = vmatmul.mubr.msk.f32.gmra.mxu1 %vm174_vm0, %v148_v29  ;;  %v409_v29 = vpop.permute.xlu0 %408 }
  0xac   :  { %358 = vmatprep.mubr.f32.mxu1 %v939_v19 }
  0xad   :  { %814 = vmatmul.mubr.msk.f32.gmra.mxu0 %vm174_vm0, %v149_v30 }
  0xae   :  { %487 = vmatprep.mubr.f32.mxu0 %v939_v19 }
  0xaf   :  { %818 = vmatmul.mubr.msk.f32.gmra.mxu1 %vm174_vm0, %v149_v30 }
  0xb0   :  { %576 = vmatprep.mubr.f32.mxu1 %v939_v19 }
 0x161   :  { %v253_v32 = vpop.f32.mrf.mxu0 }
 0x162   :  { %v254_v42 = vadd.f32 %v253_v32, %v157_v38 }
 0x163   :  { %v342_v34 = vpop.f32.mrf.mxu1  ;;  %v255_v35 = vpop.f32.mrf.mxu0 }
 0x164   :  { %v256_v43 = vadd.f32 %v255_v35, %v157_v38  ;;  %874 = vtanh.f32 %v254_v42  ;;  %v343_v2 = vadd.f32 %v342_v34, %v157_v38  ;;  %v394_v34 = vpop.permute.xlu1 %393 }
 0x165   :  { %v344_v36 = vpop.f32.mrf.mxu1  ;;  %v259_v37 = vpop.f32.mrf.mxu0 }
 0x166   :  { %v260_v46 = vadd.f32 %v259_v37, %v162_v41  ;;  %876 = vtanh.f32 %v256_v43  ;;  %v345_v1 = vadd.f32 %v344_v36, %v157_v38  ;;  %v399_v38 = vpop.permute.xlu0 %398 }
 0x167   :  { %v348_v39 = vpop.f32.mrf.mxu1  ;;  %v261_v40 = vpop.f32.mrf.mxu0 }
 0x168   :  { %v262_v47 = vadd.f32 %v261_v40, %v162_v41  ;;  %878 = vtanh.f32 %v260_v46  ;;  %v349_v0 = vadd.f32 %v348_v39, %v162_v41 }
 0x169   :  { %v350_v44 = vpop.f32.mrf.mxu1  ;;  %v265_v45 = vpop.f32.mrf.mxu0 }
 0x16a   :  { %v266_v50 = vadd.f32 %v265_v45, %v167_v31  ;;  %880 = vtanh.f32 %v262_v47  ;;  %v351_v63 = vadd.f32 %v350_v44, %v162_v41 }
 0x16b   :  { %v354_v48 = vpop.f32.mrf.mxu1  ;;  %v267_v49 = vpop.f32.mrf.mxu0 }
 0x16c   :  { %v268_v51 = vadd.f32 %v267_v49, %v167_v31  ;;  %882 = vtanh.f32 %v266_v50  ;;  %v355_v62 = vadd.f32 %v354_v48, %v167_v31 }
 0x16d   :  { %v356_v52 = vpop.f32.mrf.mxu1  ;;  %v271_v53 = vpop.f32.mrf.mxu0 }
 0x16e   :  { %v272_v54 = vadd.f32 %v271_v53, %v172_v33  ;;  %884 = vtanh.f32 %v268_v51  ;;  %v357_v60 = vadd.f32 %v356_v52, %v167_v31 }
 0x16f   :  { %v360_v55 = vpop.f32.mrf.mxu1  ;;  %v273_v56 = vpop.f32.mrf.mxu0 }
 0x170   :  { %v274_v57 = vadd.f32 %v273_v56, %v172_v33  ;;  %v361_v58 = vadd.f32 %v360_v55, %v172_v33  ;;  %886 = vtanh.f32 %v272_v54 }
 0x171   :  { %v362_v59 = vpop.f32.mrf.mxu1  ;;  %v875_v3 = vpop.eup %874 }
 0x172   :  { %v363_v61 = vadd.f32 %v362_v59, %v172_v33  ;;  %888 = vtanh.f32 %v274_v57 }
 0x173   :  { %v877_v4 = vpop.eup %876 }
 0x174   :  { %890 = vtanh.f32 %v363_v61 }
 0x175   :  { %892 = vtanh.f32 %v361_v58  ;;  %v879_v5 = vpop.eup %878 }
 0x176   :  { %894 = vtanh.f32 %v357_v60 }
 0x177   :  { %896 = vtanh.f32 %v355_v62  ;;  %v881_v6 = vpop.eup %880 }
 0x178   :  { %898 = vtanh.f32 %v351_v63 }
 0x179   :  { %900 = vtanh.f32 %v349_v0  ;;  %v883_v7 = vpop.eup %882 }
 0x17a   :  { %902 = vtanh.f32 %v345_v1 }
 0x17b   :  { %904 = vtanh.f32 %v343_v2  ;;  %v885_v8 = vpop.eup %884 }
 0x17d   :  { %v887_v9 = vpop.eup %886 }
 0x17f   :  { %v889_v10 = vpop.eup %888 }
 0x180   :  { %447 = vmatprep.subr.mxu0 %v889_v10 }
 0x181   :  { %v891_v11 = vpop.eup %890  ;;  %448 = vmatpush1.msra.mxu0 %v887_v9 }
 0x182   :  { %v893_v12 = vpop.eup %892  ;;  %536 = vmatprep.subr.mxu1 %v891_v11  ;;  %449 = vmatprep.subr.mxu0 %v885_v8 }
 0x183   :  { %v895_v13 = vpop.eup %894  ;;  %537 = vmatpush1.msra.mxu1 %v893_v12  ;;  %450 = vmatpush1.msra.mxu0 %v883_v7  ;;  %v617_v12 = vld [vmem:[%s1120_s5] sm:$0x1] }
 0x184   :  { %v897_v14 = vpop.eup %896  ;;  %538 = vmatprep.subr.mxu1 %v895_v13  ;;  %451 = vmatprep.subr.mxu0 %v881_v6 }
 0x185   :  { %v899_v15 = vpop.eup %898  ;;  %539 = vmatpush1.msra.mxu1 %v897_v14  ;;  %452 = vmatpush1.msra.mxu0 %v879_v5 }
 0x186   :  { %v901_v16 = vpop.eup %900  ;;  %540 = vmatprep.subr.mxu1 %v899_v15  ;;  %453 = vmatprep.subr.mxu0 %v877_v4  ;;  %v940_v15 = vmov 1966171168  }
 0x187   :  { %v903_v18 = vpop.eup %902  ;;  %541 = vmatpush1.msra.mxu1 %v901_v16  ;;  %454 = vmatpush1.msra.mxu0 %v875_v3  ;;  %v780_v16 = vunpack.c.l.s4 %v940_v15 }
 0x188   :  { %v905_v23 = vpop.eup %904  ;;  %542 = vmatprep.subr.mxu1 %v903_v18  ;;  %827 = vmatmul.mubr.msk.f32.vlgmr.msra.gmra.mxu0 %vm174_vm0, %v819_v17 }
 0x189   :  { %543 = vmatpush1.msra.mxu1 %v905_v23  ;;  %493 = vmatprep.mubr.f32.mxu0 %v939_v19  ;;  %v781_v18 = vunpack.c.0.s8 %v780_v16 }
 0x18a   :  { %831 = vmatmul.mubr.msk.f32.vlgmr.msra.gmra.mxu1 %vm174_vm0, %v819_v17  ;;  %v622_v17 = vpop.permute.xlu0 %621 }
 0x18b   :  { %582 = vmatprep.mubr.f32.mxu1 %v939_v19 }
 0x18c   :  { %828 = vmatmul.mubr.msk.f32.gmra.mxu0 %vm174_vm0, %v820_v24 }
 0x18d   :  { %499 = vmatprep.mubr.f32.mxu0 %v939_v19 }
 0x18e   :  { %832 = vmatmul.mubr.msk.f32.gmra.mxu1 %vm174_vm0, %v820_v24  ;;  %v627_v24 = vrot.slane %v622_v17, %v56_v22 }
 0x18f   :  { %588 = vmatprep.mubr.f32.mxu1 %v939_v19 }
 0x190   :  { %829 = vmatmul.mubr.msk.f32.gmra.mxu0 %vm174_vm0, %v821_v25 }
 0x191   :  { %505 = vmatprep.mubr.f32.mxu0 %v939_v19 }
 0x192   :  { %833 = vmatmul.mubr.msk.f32.gmra.mxu1 %vm174_vm0, %v821_v25 }
 0x193   :  { %594 = vmatprep.mubr.f32.mxu1 %v939_v19 }
 0x194   :  { %830 = vmatmul.mubr.msk.f32.gmra.mxu0 %vm174_vm0, %v822_v26 }
 0x195   :  { %695 = vmatprep.mubr.f32.mxu0 %v939_v19 }
 0x196   :  { %834 = vmatmul.mubr.msk.f32.gmra.mxu1 %vm174_vm0, %v822_v26 }
 0x197   :  { %766 = vmatprep.mubr.f32.mxu1 %v939_v19 }
 0x248   :  { %v489_v28 = vpop.f32.mrf.mxu0 }
 0x249   :  { %v490_v36 = vadd.f32 %v489_v28, %v394_v34 }
 0x24a   :  { %v578_v30 = vpop.f32.mrf.mxu1  ;;  %v491_v31 = vpop.f32.mrf.mxu0 }
 0x24b   :  { %v492_v39 = vadd.f32 %v491_v31, %v394_v34  ;;  %906 = vtanh.f32 %v490_v36  ;;  %v579_v61 = vadd.f32 %v578_v30, %v394_v34 }
 0x24c   :  { %v580_v32 = vpop.f32.mrf.mxu1  ;;  %v495_v33 = vpop.f32.mrf.mxu0 }
 0x24d   :  { %v496_v41 = vadd.f32 %v495_v33, %v399_v38  ;;  %908 = vtanh.f32 %v492_v39  ;;  %v581_v60 = vadd.f32 %v580_v32, %v394_v34 }
 0x24e   :  { %v584_v35 = vpop.f32.mrf.mxu1  ;;  %v497_v37 = vpop.f32.mrf.mxu0 }
 0x24f   :  { %v498_v43 = vadd.f32 %v497_v37, %v399_v38  ;;  %910 = vtanh.f32 %v496_v41  ;;  %v585_v59 = vadd.f32 %v584_v35, %v399_v38 }
 0x250   :  { %v586_v40 = vpop.f32.mrf.mxu1  ;;  %v501_v42 = vpop.f32.mrf.mxu0 }
 0x251   :  { %v502_v19 = vadd.f32 %v501_v42, %v404_v27  ;;  %912 = vtanh.f32 %v498_v43  ;;  %v587_v58 = vadd.f32 %v586_v40, %v399_v38 }
 0x252   :  { %v590_v44 = vpop.f32.mrf.mxu1  ;;  %v503_v45 = vpop.f32.mrf.mxu0 }
 0x253   :  { %v504_v46 = vadd.f32 %v503_v45, %v404_v27  ;;  %914 = vtanh.f32 %v502_v19  ;;  %v591_v57 = vadd.f32 %v590_v44, %v404_v27 }
 0x254   :  { %v592_v47 = vpop.f32.mrf.mxu1  ;;  %v507_v48 = vpop.f32.mrf.mxu0 }
 0x255   :  { %v508_v49 = vadd.f32 %v507_v48, %v409_v29  ;;  %916 = vtanh.f32 %v504_v46  ;;  %v593_v55 = vadd.f32 %v592_v47, %v404_v27 }
 0x256   :  { %v596_v50 = vpop.f32.mrf.mxu1  ;;  %v509_v51 = vpop.f32.mrf.mxu0 }
 0x257   :  { %v597_v52 = vadd.f32 %v596_v50, %v409_v29  ;;  %v510_v53 = vadd.f32 %v509_v51, %v409_v29  ;;  %918 = vtanh.f32 %v508_v49 }
 0x258   :  { %v598_v54 = vpop.f32.mrf.mxu1  ;;  %v907_v62 = vpop.eup %906 }
 0x259   :  { %v599_v56 = vadd.f32 %v598_v54, %v409_v29  ;;  %920 = vtanh.f32 %v510_v53  ;;  %v784_v29 = vsub.s32 %v781_v18, %v1035_v21 }
 0x25a   :  { %v909_v63 = vpop.eup %908 }
 0x25b   :  { %922 = vtanh.f32 %v599_v56 }
 0x25c   :  { %924 = vtanh.f32 %v597_v52  ;;  %v911_v0 = vpop.eup %910 }
 0x25d   :  { %926 = vtanh.f32 %v593_v55 }
 0x25e   :  { %928 = vtanh.f32 %v591_v57  ;;  %v913_v1 = vpop.eup %912 }
 0x25f   :  { %930 = vtanh.f32 %v587_v58 }
 0x260   :  { %932 = vtanh.f32 %v585_v59  ;;  %v915_v2 = vpop.eup %914 }
 0x261   :  { %934 = vtanh.f32 %v581_v60 }
 0x262   :  { %936 = vtanh.f32 %v579_v61  ;;  %v917_v3 = vpop.eup %916 }
 0x264   :  { %v919_v4 = vpop.eup %918 }
 0x266   :  { %v921_v5 = vpop.eup %920 }
 0x267   :  { %655 = vmatprep.subr.mxu0 %v921_v5 }
 0x268   :  { %v923_v6 = vpop.eup %922  ;;  %656 = vmatpush1.msra.mxu0 %v919_v4 }
 0x269   :  { %v925_v7 = vpop.eup %924  ;;  %726 = vmatprep.subr.mxu1 %v923_v6  ;;  %657 = vmatprep.subr.mxu0 %v917_v3 }
 0x26a   :  { %v927_v8 = vpop.eup %926  ;;  %727 = vmatpush1.msra.mxu1 %v925_v7  ;;  %658 = vmatpush1.msra.mxu0 %v915_v2 }
 0x26b   :  { %v929_v9 = vpop.eup %928  ;;  %728 = vmatprep.subr.mxu1 %v927_v8  ;;  %659 = vmatprep.subr.mxu0 %v913_v1 }
 0x26c   :  { %v931_v10 = vpop.eup %930  ;;  %729 = vmatpush1.msra.mxu1 %v929_v9  ;;  %660 = vmatpush1.msra.mxu0 %v911_v0 }
 0x26d   :  { %v933_v11 = vpop.eup %932  ;;  %730 = vmatprep.subr.mxu1 %v931_v10  ;;  %661 = vmatprep.subr.mxu0 %v909_v63 }
 0x26e   :  { %v935_v13 = vpop.eup %934  ;;  %731 = vmatpush1.msra.mxu1 %v933_v11  ;;  %662 = vmatpush1.msra.mxu0 %v907_v62 }
 0x26f   :  { %v937_v14 = vpop.eup %936  ;;  %732 = vmatprep.subr.mxu1 %v935_v13  ;;  %835 = vmatmul.mubr.msk.f32.vlgmr.msra.gmra.mxu0 %vm174_vm0, %v617_v12 }
 0x270   :  { %733 = vmatpush1.msra.mxu1 %v937_v14 }
 0x271   :  { %836 = vmatmul.mubr.msk.f32.vlgmr.msra.gmra.mxu1 %vm174_vm0, %v617_v12 }
 0x32f   :  { %v697_v23 = vpop.f32.mrf.mxu0 }
 0x330   :  { %v698_v27 = vadd.f32 %v697_v23, %v627_v24 }
 0x331   :  { %v768_v25 = vpop.f32.mrf.mxu1  ;;  %v699_v26 = vpop.f32.mrf.mxu0 }
 0x332   :  { %v700_v28 = vadd.f32 %v699_v26, %v627_v24  ;;  %v769_v31 = vadd.f32 %v768_v25, %v627_v24 }
 0x333   :  { %v770_v30 = vpop.f32.mrf.mxu1 }
 0x334   :  { %v771_v32 = vadd.f32 %v770_v30, %v627_v24  ;;  %v777_v33 = vcombine.low %v698_v27, %v700_v28 }
 0x336   :  { %v778_v34 = vcombine.low %v769_v31, %v771_v32  ;;  %v785_v35 = vrot.slane %v777_v33, %v784_v29 }
 0x338   :  { %v792_v36 = vrot.slane %v778_v34, %v784_v29 }
 0x33a   :  { %v793_v37 = vcombine.low %v785_v35, %v792_v36 }
 0x33c   :  { %v800_v38 = vrot.slane %v793_v37, %v784_v29 }
 0x33e   :  { %806 = vst.msk [vmem:[%s1121_s7] sm:$0xf] %vm804_vm1, %v800_v38 }

</bundles_post_ra>
